<compile_context>
chip_gen: v7x
topology: tpu7x:2x2x1
jax: 0.10.0
libtpu: 0.0.40
codegen_flags: <defaults>
</compile_context>

<pallas_src>
import jax
import jax.numpy as jnp
from jax.experimental import pallas as pl
from jax.experimental.pallas import tpu as pltpu


def _round_up(x: int, m: int) -> int:
    return pl.cdiv(x, m) * m


def _lead_time_mlp_kernel(x_ref, w_ref, o_ref):
    """One batch tile: o = x_tile @ W_combined (single MXU pass, f32 acc)."""
    o_ref[...] = jnp.dot(
        x_ref[...], w_ref[...], preferred_element_type=jnp.float32
    ).astype(o_ref.dtype)


def lead_time_mlp_forward(
    leadtime: jax.Array,
    weights_t,
    *,
    compute_dtype=jnp.float32,
    block_rows: int = 512,
) -> jax.Array:
    """Pallas forward for LeadTimeMLPSystem.

    Args:
      leadtime: (batch, lead_timesteps) float32.
      weights_t: list of weight matrices already transposed to
        (in_features, out_features), matching nn.Linear(x) = x @ W.T.
      compute_dtype: dtype fed to the MXU (f32 or bf16); accumulation is
        always f32 and the returned array is f32.
      block_rows: batch-tile rows (>= 512 recommended at large batch; keep
        modest on v7x's smaller VMEM).

    Returns:
      (batch, master_out_features) float32.
    """
    batch, k = leadtime.shape

    # ---- Fold the activation-free Linear chain into one matrix (offline). ----
    w_combined = weights_t[0].astype(jnp.float32)
    for w in weights_t[1:]:
        w_combined = w_combined @ w.astype(jnp.float32)
    n = w_combined.shape[1]

    # ---- Pad to lane-dense tiles: K -> mult of 128, N -> mult of 128,
    #      batch -> mult of the batch tile (itself a multiple of 8). ----
    k_pad = _round_up(k, 128)
    n_pad = _round_up(n, 128)
    tb = min(block_rows, _round_up(batch, 8))
    tb = _round_up(tb, 8)
    b_pad = _round_up(batch, tb)

    x_p = (
        jnp.zeros((b_pad, k_pad), compute_dtype)
        .at[:batch, :k]
        .set(leadtime.astype(compute_dtype))
    )
    w_p = (
        jnp.zeros((k_pad, n_pad), compute_dtype)
        .at[:k, :n]
        .set(w_combined.astype(compute_dtype))
    )

    grid = (b_pad // tb,)
    out = pl.pallas_call(
        _lead_time_mlp_kernel,
        out_shape=jax.ShapeDtypeStruct((b_pad, n_pad), jnp.float32),
        grid=grid,
        in_specs=[
            pl.BlockSpec((tb, k_pad), lambda i: (i, 0)),     # batch tile of x
            pl.BlockSpec((k_pad, n_pad), lambda i: (0, 0)),  # W resident in VMEM
        ],
        out_specs=pl.BlockSpec((tb, n_pad), lambda i: (i, 0)),
        compiler_params=pltpu.CompilerParams(
            # Independent batch tiles -> shards across both TCs on v7x.
            dimension_semantics=("parallel",),
        ),
    )(x_p, w_p)

    return out[:batch, :n]


def make_lead_time_mlp_params(
    key: jax.Array,
    lead_timesteps: int,
    master_layers: int = 2,
    master_out_features: int = 512,
):
    """Deterministically build the weight stack of LeadTimeMLPSystem.

    Mirrors _make_master(): (master_layers - 1) square Linear layers
    (lead_timesteps -> lead_timesteps) followed by one
    (lead_timesteps -> master_out_features) layer, all bias-free.
    Weights are returned already transposed to (in, out) for the kernel.
    """
    params = []
    bound = 1.0 / jnp.sqrt(jnp.float32(lead_timesteps))
    for _ in range(master_layers - 1):
        key, sub = jax.random.split(key)
        # PyTorch stores (out, in); generate in that shape then transpose.
        w = jax.random.uniform(
            sub, (lead_timesteps, lead_timesteps), jnp.float32, -bound, bound
        )
        params.append(w.T)
    key, sub = jax.random.split(key)
    w_last = jax.random.uniform(
        sub, (master_out_features, lead_timesteps), jnp.float32, -bound, bound
    )
    params.append(w_last.T)
    return params


if __name__ == "__main__":
    # Small shapes consistent with the module's forward:
    #   leadtime: (batch, lead_timesteps) -> (batch, master_out_features)
    batch = 300                 # not a multiple of the tile -> exercises padding
    lead_timesteps = 8
    master_layers = 3           # exercises the multi-layer weight fold
    master_out_features = 256

    key = jax.random.PRNGKey(0)
    key, k_in = jax.random.split(key)
    leadtime = jax.random.normal(k_in, (batch, lead_timesteps), jnp.float32)

    weights_t = make_lead_time_mlp_params(
        key, lead_timesteps, master_layers, master_out_features
    )

    # Reference in plain JAX: the unfused chain x @ W0 @ W1 @ W2.
    ref = leadtime
    for w in weights_t:
        ref = ref @ w

    # f32 compute path (exact up to fold-order rounding), multi-tile grid.
    out_f32 = lead_time_mlp_forward(
        leadtime, weights_t, compute_dtype=jnp.float32, block_rows=128
    )
    out_f32 = jax.block_until_ready(out_f32)
    assert out_f32.shape == (batch, master_out_features)
    assert jnp.allclose(out_f32, ref, atol=1e-4, rtol=1e-4)

    # bf16 compute path (halves HBM traffic; f32 MXU accumulation).
    out_bf16 = lead_time_mlp_forward(
        leadtime, weights_t, compute_dtype=jnp.bfloat16, block_rows=128
    )
    out_bf16 = jax.block_until_ready(out_bf16)
    assert out_bf16.shape == (batch, master_out_features)
    assert jnp.allclose(out_bf16, ref, atol=2e-2, rtol=2e-2)

    print("KERNEL_OK")
</pallas_src>

<mosaic_0001>
module attributes {stable_mosaic.version = 11 : i64} {
  func.func @_lead_time_mlp_kernel(%arg0: i32, %arg1: memref<128x128xf32, #tpu.memory_space<vmem>>, %arg2: memref<128x256xf32, #tpu.memory_space<vmem>>, %arg3: memref<128x256xf32, #tpu.memory_space<vmem>>) attributes {dimension_semantics = [#tpu.dimension_semantics<parallel>], iteration_bounds = array<i64: 3>, scalar_prefetch = 0 : i64, scratch_operands = 0 : i64, tpu.core_type = #tpu.core_type<tc>, window_params = [{transform_indices = @transform_0, window_bounds = array<i64: 128, 128>}, {pipeline_mode = #tpu.pipeline_mode<synchronous>, transform_indices = @transform_1, window_bounds = array<i64: 128, 256>}, {transform_indices = @transform_2, window_bounds = array<i64: 128, 256>}]} {
    %c0 = arith.constant 0 : index
    %c0_0 = arith.constant 0 : index
    %0 = vector.load %arg1[%c0, %c0_0] : memref<128x128xf32, #tpu.memory_space<vmem>>, vector<128x128xf32>
    %c0_1 = arith.constant 0 : index
    %c0_2 = arith.constant 0 : index
    %1 = vector.load %arg2[%c0_1, %c0_2] : memref<128x256xf32, #tpu.memory_space<vmem>>, vector<128x256xf32>
    %cst = arith.constant dense<0.000000e+00> : vector<128x256xf32>
    %2 = tpu.matmul %0, %1, %cst {dimension_numbers = #tpu.dot_dimension_numbers<[1], [0], [0], [1], [0, 0, 1, 1], [], []>} : vector<128x128xf32>, vector<128x256xf32>, vector<128x256xf32> -> vector<128x256xf32>
    %c0_3 = arith.constant 0 : index
    %c0_4 = arith.constant 0 : index
    %3 = vector.load %arg3[%c0_3, %c0_4] : memref<128x256xf32, #tpu.memory_space<vmem>>, vector<128x256xf32>
    tpu.vector_store %arg3[%c0_3, %c0_4], %2 {strides = array<i32>} : memref<128x256xf32, #tpu.memory_space<vmem>>, vector<128x256xf32>,
    return
  }
  func.func @transform_0(%arg0: i32) -> (i32, i32) {
    %c0_i32 = arith.constant 0 : i32
    %c0_i32_0 = arith.constant 0 : i32
    return %arg0, %c0_i32 : i32, i32
  }
  func.func @transform_1(%arg0: i32) -> (i32, i32) {
    %c0_i32 = arith.constant 0 : i32
    %c0_i32_0 = arith.constant 0 : i32
    %c0_i32_1 = arith.constant 0 : i32
    return %c0_i32, %c0_i32_0 : i32, i32
  }
  func.func @transform_2(%arg0: i32) -> (i32, i32) {
    %c0_i32 = arith.constant 0 : i32
    %c0_i32_0 = arith.constant 0 : i32
    return %arg0, %c0_i32 : i32, i32
  }
}

</mosaic_0001>

<bundles_post_ra>
// kernel: tpu_custom_call.1
= control target key start
LH: loop header
LB: loop body
LE: loop exit
PB: predicated region body
PF: predicated region fallthrough
CT: control target
= control target key end

     0   :  { %7 = vsyncpa [#allocation3], 0  ;;  %s1067_s0 = inlined_call_operand.hbm [shape: f32[384,128], index: 0, kind: input, shape index: {}]   ;;  %s1068_s1 = inlined_call_operand.hbm [shape: f32[128,256], index: 1, kind: input, shape index: {}]   ;;  %s1069_s2 = inlined_call_operand.hbm [shape: f32[384,256], index: 2, kind: output, shape index: {}]  }
   0x1   :  { %9 = vsyncpa [#allocation3 + $0x1], 0 }
   0x2   :  { %10 = vsyncpa [#allocation6], 0 }
   0x3   :  { %11 = vsyncpa [#allocation4], 0 }
   0x4   :  { %13 = vsyncpa [#allocation4 + $0x1], 0  ;;  %s805_s9 = smov 0   ;;  %s807_s10 = smov 0  }
   0x5   :  { %s809_s11 = smov 0   ;;  %s811_s12 = smov 0  }
   0x6 LB: > { %s826_s13 = sadd.s32 4294967295, %s778_s12   ;;  %s518_s14 = sadd.s32 4294967294, %s778_s12   ;;  %s778_s12 = sphi %s811_s12, %s1088_s12   ;;  %s774_s11 = sphi %s809_s11, %s1087_s11   ;;  %s770_s10 = sphi %s807_s10, %s1086_s10   ;;  %s766_s9 = sphi %s805_s9, %s1085_s9  }
   0x7   : > { %p39_p0 = scmp.ne.s32.totalorder %s770_s10, %s766_s9  ;;  %p1070_p1 = scmp.eq.s32.totalorder %s826_s13, 0 }
   0x8   : > { %p90_p3 = scmp.eq.s32.totalorder %s518_s14, 2  ;;  %p519_p5 = scmp.ge.s32.totalorder %s778_s12, 1 }
   0x9   : > { %p835_p4 = por %p1070_p1, %p39_p0  ;;  %p97_p7 = scmp.lt.s32.totalorder %s778_s12, 4 }
   0xa   : > { %p840_p6 = por %p90_p3, %p39_p0  ;;  %s780_s18 = smov [#allocation5]  }
   0xb   : > { %s1073_s15 = scalar_select %p835_p4, 1, 0 }
   0xc   : > { %s1074_s16 = scalar_select %p840_p6, 1, 0 }
   0xd   : > { %p845_p8 = pnand %p519_p5, %p97_p7  ;;  %s109_s19 = sshll.u32 %s780_s18, 4  ;;  %s110_s19 = int_to_ptr.vmem [resolvable:$true] %s109_s19 }
   0xe   : > { %s858_s21 = sadd.s32 1, %s778_s12   ;;  %s26_s22 = sadd.s32 1, %s774_s11 }
   0xf   : > { %s1075_s17 = scalar_select %p845_p8, 1, 0 }
  0x10   : > { %p594_p9 = pneg %p845_p8  ;;  %s23_s23 = ssub.s32 %s778_s12, %s858_s21 }
  0x11   : > { %s650_s26 = scalar_lea.hbm %s1068_s1, 4096 }
  0x12   : > { %p853_p10 = pnand %p594_p9, %p1070_p1  ;;  %p651_p11 = scmp.ne.s32.totalorder %s1068_s1, %s650_s26 }
  0x13   : > { %p657_p3 = scmp.lt.u32.totalorder %s650_s26, %s1068_s1 }
  0x14   : > { %p652_p12 = pneg %p853_p10 }
  0x16   : > { %p653_p13 = pnand %p652_p12, %p651_p11 }
  0x18   : > { %p654_p0 = pneg %p653_p13 }
  0x1a   : > { %p659_p5 = pnand %p657_p3, %p654_p0 }
  0x1c   : > { %662 = shalt.err (!%p659_p5)
}
  0x1d   : > { %s663_s3 = scalar_lea.vmem %s110_s19, 4096  ;;  %p671_p2 = scmp.lt.s32.totalorder %s110_s19, %s110_s19 }
  0x1e   : > { %p664_p7 = scmp.ne.s32.totalorder %s110_s19, %s663_s3  ;;  %p672_p6 = scmp.lt.s32.totalorder %s663_s3, %s663_s3 }
  0x20   : > { %p666_p9 = pnand %p664_p7, %p652_p12  ;;  %p673_p4 = por %p672_p6, %p671_p2 }
  0x22   : > { %p667_p1 = pneg %p666_p9 }
  0x24   : > { %p674_p8 = pnand %p673_p4, %p667_p1 }
  0x26   : > { %677 = shalt.err (!%p674_p8)
}
  0x27   : > { %s781_s4 = smov 256   ;;  %s782_s5 = smov 16  }
  0x28   : > { %597 = dma.hbm_to_vmem [thread:$0]  (!%p853_p10), %s1068_s1, 4096, %s110_s19, [#allocation6], %s781_s4, %s781_s4, %s782_s5  }
  0x29   : > { %p24_p11 = scmp.eq.s32.totalorder %s23_s23, 0  ;;  %p33_p2 = scmp.ne.s32.totalorder %s774_s11, %s770_s10 }
  0x2a   : > { %p34_p1 = scmp.eq.s32.totalorder %s778_s12, 0  ;;  %p607_p4 = scmp.lt.s32.totalorder %s778_s12, 3 }
  0x2b   : > { %s884_s8 = scalar_select %p24_p11, %s774_s11, %s26_s22  }
  0x2c   : > { %p35_p6 = por %p34_p1, %p33_p2  ;;  %p1077_p8 = scmp.eq.s32.totalorder %s826_s13, 2 }
  0x2d   : > { %s123_s18 = sand.u32 1, %s774_s11   ;;  %s535_s24 = sshll.u32 %s778_s12, 11 }
  0x2e   : > { %p888_p12 = por %p1077_p8, %p33_p2  ;;  %s522_s25 = sshll.u32 %s123_s18, 7 }
  0x2f   : > { %s897_s27 = scalar_lea.hbm %s1067_s0, %s535_s24  ;;  %s127_s19 = scalar_lea.vmem [#allocation2], %s522_s25 }
  0x30   : > { %s134_s22 = sshll.u32 %s127_s19, 4  ;;  %p899_p10 = pnand %p607_p4, %p35_p6  ;;  %s903_s22 = int_to_ptr.vmem [resolvable:$true] %s134_s22 }
  0x31   : > { %s905_s28 = scalar_lea.sflag [#allocation3], %s123_s18  ;;  %s678_s29 = scalar_lea.hbm %s897_s27, 2048 }
  0x32   : > { %p679_p13 = scmp.ne.s32.totalorder %s897_s27, %s678_s29  ;;  %p680_p0 = pneg %p899_p10 }
  0x33   : > { %s683_s4 = scalar_lea.hbm %s1067_s0, 6144  ;;  %p684_p7 = scmp.lt.u32.totalorder %s897_s27, %s1067_s0 }
  0x34   : > { %p681_p3 = pnand %p680_p0, %p679_p13  ;;  %p685_p9 = scmp.lt.u32.totalorder %s683_s4, %s678_s29 }
  0x35   : > { %p687_p2 = scmp.lt.u32.totalorder %s678_s29, %s897_s27 }
  0x36   : > { %p682_p5 = pneg %p681_p3  ;;  %p686_p11 = por %p685_p9, %p684_p7 }
  0x38   : > { %p688_p1 = por %p687_p2, %p686_p11 }
  0x3a   : > { %p689_p4 = pnand %p688_p1, %p682_p5 }
  0x3c   : > { %692 = shalt.err (!%p689_p4)
}
  0x3d   : > { %s693_s7 = scalar_lea.vmem %s903_s22, 2048  ;;  %s783_s18 = smov [#allocation2]  }
  0x3e   : > { %p694_p6 = scmp.ne.s32.totalorder %s903_s22, %s693_s7  ;;  %s698_s24 = sshll.u32 %s783_s18, 4  ;;  %s699_s24 = int_to_ptr.vmem [resolvable:$false] %s698_s24 }
  0x3f   : > { %s700_s25 = scalar_lea.vmem %s699_s24, 4096  ;;  %p701_p3 = scmp.lt.s32.totalorder %s903_s22, %s699_s24 }
  0x40   : > { %p696_p8 = pnand %p694_p6, %p680_p0  ;;  %p702_p7 = scmp.lt.s32.totalorder %s700_s25, %s693_s7 }
  0x42   : > { %p697_p13 = pneg %p696_p8  ;;  %p703_p9 = por %p702_p7, %p701_p3 }
  0x44   : > { %p704_p11 = pnand %p703_p9, %p697_p13 }
  0x46   : > { %707 = shalt.err (!%p704_p11)
}
  0x47   : > { %s784_s20 = smov 128   ;;  %s785_s26 = smov 8  }
  0x48   : > { %601 = dma.hbm_to_vmem [thread:$0]  (!%p899_p10), %s897_s27, 2048, %s903_s22, %s905_s28, %s784_s20, %s784_s20, %s785_s26  }
  0x49   : > { %p1080_p0 = scmp.ne.s32.totalorder %s1075_s17, 0 }
  0x4a   : > { %s936_s19 = sand.u32 (!%p1080_p0), 1, %s770_s10   ;;  %p1081_p5 = scmp.ne.s32.totalorder (!%p1080_p0), %s1073_s15, 0 }
  0x4b   : > { %146 = sbr.rel (%p1080_p0) target bundleno = 377 (0x179), region = 28  ;;  %s526_s29 = sshll.u32 (!%p1080_p0), %s936_s19, 7 }
  0x4c   : > { %s149_s30 = scalar_lea.sflag (!%p1080_p0), [#allocation3], %s936_s19  ;;  %s940_s3 = scalar_lea.vmem (!%p1080_p0), [#allocation2], %s526_s29 }
  0x52   : > { %753 = dma.done.wait (%p1081_p5), %s149_s30, 2048  }
  0x53   : > { %755 = vsyncadd (%p1081_p5), %s149_s30, 4294965248  ;;  %p1082_p10 = scmp.eq.s32.totalorder %s826_s13, 0 }
  0x55   : > { %757 = dma.done.wait (%p1082_p10), [#allocation6], 4096   ;;  %p1083_p2 = pmov %p1082_p10 }
  0x56   : > { %v786_v0 = vmov 0.0   ;;  %v196_v1 = vld [vmem:[#allocation5 + $0x8] sm:$0xff]  ;;  %v198_v2 = vld [vmem:[#allocation5 + $0x18] sm:$0xff]  ;;  %v195_v3 = vld [vmem:[#allocation5] sm:$0xff]  ;;  %s528_s15 = sshll.u32 %s936_s19, 8  ;;  %s537_s27 = sshll.u32 %s826_s13, 12 }
  0x57   : > { %759 = vsyncadd (%p1083_p2), [#allocation6], 4294963200  ;;  %291 = vmatprep.mubr.f32.mxu0 %v786_v0  ;;  %339 = vmatprep.mubr.f32.mxu1 %v786_v0  ;;  %v538_v4 = vpack.c.bf16 %v198_v2, %v196_v1  ;;  %v197_v5 = vld [vmem:[#allocation5 + $0x10] sm:$0xff]  ;;  %v200_v6 = vld [vmem:[#allocation5 + $0x28] sm:$0xff]  ;;  %s983_s17 = scalar_lea.vmem [#allocation7], %s528_s15  ;;  %s1018_s4 = scalar_lea.hbm %s1069_s2, %s537_s27 }
  0x58   : > { %v202_v7 = vld [vmem:[#allocation5 + $0x38] sm:$0xff]  ;;  %v540_v8 = vpack.c.bf16 %v197_v5, %v195_v3  ;;  %v199_v10 = vld [vmem:[#allocation5 + $0x20] sm:$0xff]  ;;  %v201_v11 = vld [vmem:[#allocation5 + $0x30] sm:$0xff]  ;;  %s435_s22 = sshll.u32 %s983_s17, 4  ;;  %s421_s13 = scalar_lea.sflag [#allocation4], %s936_s19  ;;  %s1020_s22 = int_to_ptr.vmem [resolvable:$true] %s435_s22 }
  0x59   : > { %v542_v9 = vpack.c.bf16 %v202_v7, %v200_v6  ;;  %v204_v12 = vld [vmem:[#allocation5 + $0x48] sm:$0xff]  ;;  %539 = vmatprep.subr.bf16.mxu0 %v538_v4  ;;  %570 = vmatprep.subr.bf16.mxu1 %v538_v4  ;;  %v206_v13 = vld [vmem:[#allocation5 + $0x58] sm:$0xff]  ;;  %v544_v14 = vpack.c.bf16 %v201_v11, %v199_v10  ;;  %v203_v16 = vld [vmem:[#allocation5 + $0x40] sm:$0xff]  ;;  %s708_s5 = scalar_lea.vmem %s1020_s22, 4096  ;;  %s787_s6 = smov [#allocation7]  }
  0x5a   : > { %541 = vmatpush1.bf16.msra.mxu0 %v540_v8  ;;  %578 = vmatpush1.bf16.msra.mxu1 %v540_v8  ;;  %v546_v15 = vpack.c.bf16 %v206_v13, %v204_v12  ;;  %v205_v17 = vld [vmem:[#allocation5 + $0x50] sm:$0xff]  ;;  %v208_v18 = vld [vmem:[#allocation5 + $0x68] sm:$0xff]  ;;  %v210_v19 = vld [vmem:[#allocation5 + $0x78] sm:$0xff]  ;;  %p709_p1 = scmp.ne.s32.totalorder %s1020_s22, %s708_s5  ;;  %s712_s7 = sshll.u32 %s787_s6, 4  ;;  %s713_s7 = int_to_ptr.vmem [resolvable:$false] %s712_s7 }
  0x5b   : > { %543 = vmatprep.subr.bf16.mxu0 %v542_v9  ;;  %571 = vmatprep.subr.bf16.mxu1 %v542_v9  ;;  %v548_v20 = vpack.c.bf16 %v205_v17, %v203_v16  ;;  %v550_v21 = vpack.c.bf16 %v210_v19, %v208_v18  ;;  %v207_v22 = vld [vmem:[#allocation5 + $0x60] sm:$0xff]  ;;  %v209_v23 = vld [vmem:[#allocation5 + $0x70] sm:$0xff]  ;;  %v212_v24 = vld [vmem:[#allocation5 + $0x88] sm:$0xff]  ;;  %s714_s18 = scalar_lea.vmem %s713_s7, 8192  ;;  %p715_p8 = scmp.lt.s32.totalorder %s1020_s22, %s713_s7 }
  0x5c   : > { %v214_v25 = vld [vmem:[#allocation5 + $0x98] sm:$0xff]  ;;  %v552_v26 = vpack.c.bf16 %v209_v23, %v207_v22  ;;  %v211_v28 = vld [vmem:[#allocation5 + $0x80] sm:$0xff]  ;;  %v213_v29 = vld [vmem:[#allocation5 + $0x90] sm:$0xff]  ;;  %p710_p4 = pnand %p709_p1, %p888_p12  ;;  %p716_p13 = scmp.lt.s32.totalorder %s714_s18, %s708_s5 }
  0x5d   : > { %v554_v27 = vpack.c.bf16 %v214_v25, %v212_v24  ;;  %v216_v30 = vld [vmem:[#allocation5 + $0xa8] sm:$0xff]  ;;  %v218_v31 = vld [vmem:[#allocation5 + $0xb8] sm:$0xff]  ;;  %v556_v32 = vpack.c.bf16 %v213_v29, %v211_v28  ;;  %v215_v34 = vld [vmem:[#allocation5 + $0xa0] sm:$0xff] }
  0x5e   : > { %545 = vmatpush1.bf16.msra.mxu0 %v544_v14  ;;  %579 = vmatpush1.bf16.msra.mxu1 %v544_v14  ;;  %v558_v33 = vpack.c.bf16 %v218_v31, %v216_v30  ;;  %v217_v35 = vld [vmem:[#allocation5 + $0xb0] sm:$0xff]  ;;  %v220_v36 = vld [vmem:[#allocation5 + $0xc8] sm:$0xff]  ;;  %v222_v37 = vld [vmem:[#allocation5 + $0xd8] sm:$0xff]  ;;  %p711_p6 = pneg %p710_p4  ;;  %p717_p3 = por %p716_p13, %p715_p8 }
  0x5f   : > { %547 = vmatprep.subr.bf16.mxu0 %v546_v15  ;;  %572 = vmatprep.subr.bf16.mxu1 %v546_v15  ;;  %v560_v38 = vpack.c.bf16 %v217_v35, %v215_v34  ;;  %v562_v39 = vpack.c.bf16 %v222_v37, %v220_v36  ;;  %v219_v40 = vld [vmem:[#allocation5 + $0xc0] sm:$0xff]  ;;  %v221_v41 = vld [vmem:[#allocation5 + $0xd0] sm:$0xff]  ;;  %v224_v42 = vld [vmem:[#allocation5 + $0xe8] sm:$0xff] }
  0x60   : > { %v226_v43 = vld [vmem:[#allocation5 + $0xf8] sm:$0xff]  ;;  %v564_v44 = vpack.c.bf16 %v221_v41, %v219_v40  ;;  %v223_v46 = vld [vmem:[#allocation5 + $0xe0] sm:$0xff]  ;;  %v225_v47 = vld [vmem:[#allocation5 + $0xf0] sm:$0xff]  ;;  %p718_p7 = pnand %p717_p3, %p711_p6 }
  0x61   : > { %v566_v45 = vpack.c.bf16 %v226_v43, %v224_v42  ;;  %v568_v48 = vpack.c.bf16 %v225_v47, %v223_v46  ;;  %v179_v49 = vld [vmem:[%s940_s3] sm:$0xff]  ;;  %v180_v51 = vld [vmem:[%s940_s3 + $0x8] sm:$0xff]  ;;  %v181_v53 = vld [vmem:[%s940_s3 + $0x10] sm:$0xff] }
  0x62   : > { %549 = vmatpush1.bf16.msra.mxu0 %v548_v20  ;;  %580 = vmatpush1.bf16.msra.mxu1 %v548_v20  ;;  %v187_v50 = vld [vmem:[%s940_s3 + $0x40] sm:$0xff]  ;;  %v188_v52 = vld [vmem:[%s940_s3 + $0x48] sm:$0xff]  ;;  %v189_v54 = vld [vmem:[%s940_s3 + $0x50] sm:$0xff] }
  0x63   : > { %551 = vmatprep.subr.bf16.mxu0 %v550_v21  ;;  %573 = vmatprep.subr.bf16.mxu1 %v550_v21  ;;  %v182_v55 = vld [vmem:[%s940_s3 + $0x18] sm:$0xff]  ;;  %v183_v57 = vld [vmem:[%s940_s3 + $0x20] sm:$0xff]  ;;  %v184_v59 = vld [vmem:[%s940_s3 + $0x28] sm:$0xff] }
  0x64   : > { %v190_v56 = vld [vmem:[%s940_s3 + $0x58] sm:$0xff]  ;;  %v191_v58 = vld [vmem:[%s940_s3 + $0x60] sm:$0xff]  ;;  %v192_v60 = vld [vmem:[%s940_s3 + $0x68] sm:$0xff] }
  0x65   : > { %v185_v61 = vld [vmem:[%s940_s3 + $0x30] sm:$0xff]  ;;  %v186_v63 = vld [vmem:[%s940_s3 + $0x38] sm:$0xff] }
  0x66   : > { %553 = vmatpush1.bf16.msra.mxu0 %v552_v26  ;;  %581 = vmatpush1.bf16.msra.mxu1 %v552_v26  ;;  %v193_v62 = vld [vmem:[%s940_s3 + $0x70] sm:$0xff]  ;;  %v194_v1 = vld [vmem:[%s940_s3 + $0x78] sm:$0xff] }
  0x67   : > { %555 = vmatprep.subr.bf16.mxu0 %v554_v27  ;;  %574 = vmatprep.subr.bf16.mxu1 %v554_v27 }
  0x6a   : > { %557 = vmatpush1.bf16.msra.mxu0 %v556_v32  ;;  %582 = vmatpush1.bf16.msra.mxu1 %v556_v32 }
  0x6b   : > { %559 = vmatprep.subr.bf16.mxu0 %v558_v33  ;;  %575 = vmatprep.subr.bf16.mxu1 %v558_v33 }
  0x6e   : > { %561 = vmatpush1.bf16.msra.mxu0 %v560_v38  ;;  %583 = vmatpush1.bf16.msra.mxu1 %v560_v38 }
  0x6f   : > { %563 = vmatprep.subr.bf16.mxu0 %v562_v39  ;;  %576 = vmatprep.subr.bf16.mxu1 %v562_v39 }
  0x72   : > { %565 = vmatpush1.bf16.msra.mxu0 %v564_v44  ;;  %584 = vmatpush1.bf16.msra.mxu1 %v564_v44 }
  0x73   : > { %567 = vmatprep.subr.bf16.mxu0 %v566_v45  ;;  %577 = vmatprep.subr.bf16.mxu1 %v566_v45 }
  0x76   : > { %569 = vmatpush1.bf16.msra.mxu0 %v568_v48  ;;  %585 = vmatpush1.bf16.msra.mxu1 %v568_v48 }
  0x79   : > { %292 = vmatmul.mubr.f32.vlgmr.msra.gmra.mrb[0].mxu0 %v179_v49  ;;  %340 = vmatmul.mubr.f32.vlgmr.msra.gmra.mrb[0].mxu1 %v187_v50 }
  0x7a   : > { %297 = vmatprep.mubr.f32.mxu0 %v786_v0  ;;  %345 = vmatprep.mubr.f32.mxu1 %v786_v0 }
  0x7d   : > { %298 = vmatmul.mubr.f32.gmra.mrb[2].mxu0 %v180_v51  ;;  %346 = vmatmul.mubr.f32.gmra.mrb[2].mxu1 %v188_v52 }
  0x7e   : > { %303 = vmatprep.mubr.f32.mxu0 %v786_v0  ;;  %351 = vmatprep.mubr.f32.mxu1 %v786_v0 }
  0x81   : > { %304 = vmatmul.mubr.f32.gmra.mrb[4].mxu0 %v181_v53  ;;  %352 = vmatmul.mubr.f32.gmra.mrb[4].mxu1 %v189_v54 }
  0x82   : > { %309 = vmatprep.mubr.f32.mxu0 %v786_v0  ;;  %357 = vmatprep.mubr.f32.mxu1 %v786_v0 }
  0x85   : > { %310 = vmatmul.mubr.f32.gmra.mrb[6].mxu0 %v182_v55  ;;  %358 = vmatmul.mubr.f32.gmra.mrb[6].mxu1 %v190_v56 }
  0x86   : > { %315 = vmatprep.mubr.f32.mxu0 %v786_v0  ;;  %363 = vmatprep.mubr.f32.mxu1 %v786_v0 }
  0x89   : > { %316 = vmatmul.mubr.f32.gmra.mrb[8].mxu0 %v183_v57  ;;  %364 = vmatmul.mubr.f32.gmra.mrb[8].mxu1 %v191_v58 }
  0x8a   : > { %321 = vmatprep.mubr.f32.mxu0 %v786_v0  ;;  %369 = vmatprep.mubr.f32.mxu1 %v786_v0 }
  0x8d   : > { %322 = vmatmul.mubr.f32.gmra.mrb[10].mxu0 %v184_v59  ;;  %370 = vmatmul.mubr.f32.gmra.mrb[10].mxu1 %v192_v60 }
  0x8e   : > { %327 = vmatprep.mubr.f32.mxu0 %v786_v0  ;;  %375 = vmatprep.mubr.f32.mxu1 %v786_v0 }
  0x91   : > { %328 = vmatmul.mubr.f32.gmra.mrb[12].mxu0 %v185_v61  ;;  %376 = vmatmul.mubr.f32.gmra.mrb[12].mxu1 %v193_v62 }
  0x92   : > { %333 = vmatprep.mubr.f32.mxu0 %v786_v0  ;;  %381 = vmatprep.mubr.f32.mxu1 %v786_v0 }
  0x95   : > { %334 = vmatmul.mubr.f32.gmra.mrb[14].mxu0 %v186_v63  ;;  %382 = vmatmul.mubr.f32.gmra.mrb[14].mxu1 %v194_v1 }
 0x14c   : > { %v293_v2 = vpop.f32.mrb[0].mxu0  ;;  %v341_v3 = vpop.f32.mrb[0].mxu1 }
 0x14d   : > { %388 = vst [vmem:[%s983_s17] sm:$0xff] %v293_v2  ;;  %404 = vst [vmem:[%s983_s17 + $0x80] sm:$0xff] %v341_v3  ;;  %v295_v0 = vpop.f32.mrb[1].mxu0  ;;  %v343_v4 = vpop.f32.mrb[1].mxu1 }
 0x14e   : > { %389 = vst [vmem:[%s983_s17 + $0x8] sm:$0xff] %v295_v0  ;;  %405 = vst [vmem:[%s983_s17 + $0x88] sm:$0xff] %v343_v4 }
 0x150   : > { %v299_v5 = vpop.f32.mrb[2].mxu0  ;;  %v347_v6 = vpop.f32.mrb[2].mxu1 }
 0x151   : > { %390 = vst [vmem:[%s983_s17 + $0x10] sm:$0xff] %v299_v5  ;;  %406 = vst [vmem:[%s983_s17 + $0x90] sm:$0xff] %v347_v6  ;;  %v301_v7 = vpop.f32.mrb[3].mxu0  ;;  %v349_v8 = vpop.f32.mrb[3].mxu1 }
 0x152   : > { %391 = vst [vmem:[%s983_s17 + $0x18] sm:$0xff] %v301_v7  ;;  %407 = vst [vmem:[%s983_s17 + $0x98] sm:$0xff] %v349_v8 }
 0x154   : > { %v305_v9 = vpop.f32.mrb[4].mxu0  ;;  %v353_v10 = vpop.f32.mrb[4].mxu1 }
 0x155   : > { %392 = vst [vmem:[%s983_s17 + $0x20] sm:$0xff] %v305_v9  ;;  %408 = vst [vmem:[%s983_s17 + $0xa0] sm:$0xff] %v353_v10  ;;  %v307_v11 = vpop.f32.mrb[5].mxu0  ;;  %v355_v12 = vpop.f32.mrb[5].mxu1 }
 0x156   : > { %393 = vst [vmem:[%s983_s17 + $0x28] sm:$0xff] %v307_v11  ;;  %409 = vst [vmem:[%s983_s17 + $0xa8] sm:$0xff] %v355_v12 }
 0x158   : > { %v311_v13 = vpop.f32.mrb[6].mxu0  ;;  %v359_v14 = vpop.f32.mrb[6].mxu1 }
 0x159   : > { %394 = vst [vmem:[%s983_s17 + $0x30] sm:$0xff] %v311_v13  ;;  %410 = vst [vmem:[%s983_s17 + $0xb0] sm:$0xff] %v359_v14  ;;  %v313_v15 = vpop.f32.mrb[7].mxu0  ;;  %v361_v16 = vpop.f32.mrb[7].mxu1 }
 0x15a   : > { %395 = vst [vmem:[%s983_s17 + $0x38] sm:$0xff] %v313_v15  ;;  %411 = vst [vmem:[%s983_s17 + $0xb8] sm:$0xff] %v361_v16 }
 0x15c   : > { %v317_v17 = vpop.f32.mrb[8].mxu0  ;;  %v365_v18 = vpop.f32.mrb[8].mxu1 }
 0x15d   : > { %396 = vst [vmem:[%s983_s17 + $0x40] sm:$0xff] %v317_v17  ;;  %412 = vst [vmem:[%s983_s17 + $0xc0] sm:$0xff] %v365_v18  ;;  %v319_v19 = vpop.f32.mrb[9].mxu0  ;;  %v367_v20 = vpop.f32.mrb[9].mxu1 }
 0x15e   : > { %397 = vst [vmem:[%s983_s17 + $0x48] sm:$0xff] %v319_v19  ;;  %413 = vst [vmem:[%s983_s17 + $0xc8] sm:$0xff] %v367_v20 }
 0x160   : > { %v323_v21 = vpop.f32.mrb[10].mxu0  ;;  %v371_v22 = vpop.f32.mrb[10].mxu1 }
 0x161   : > { %398 = vst [vmem:[%s983_s17 + $0x50] sm:$0xff] %v323_v21  ;;  %414 = vst [vmem:[%s983_s17 + $0xd0] sm:$0xff] %v371_v22  ;;  %v325_v23 = vpop.f32.mrb[11].mxu0  ;;  %v373_v24 = vpop.f32.mrb[11].mxu1 }
 0x162   : > { %399 = vst [vmem:[%s983_s17 + $0x58] sm:$0xff] %v325_v23  ;;  %415 = vst [vmem:[%s983_s17 + $0xd8] sm:$0xff] %v373_v24 }
 0x164   : > { %v329_v25 = vpop.f32.mrb[12].mxu0  ;;  %v377_v26 = vpop.f32.mrb[12].mxu1 }
 0x165   : > { %400 = vst [vmem:[%s983_s17 + $0x60] sm:$0xff] %v329_v25  ;;  %416 = vst [vmem:[%s983_s17 + $0xe0] sm:$0xff] %v377_v26  ;;  %v331_v27 = vpop.f32.mrb[13].mxu0  ;;  %v379_v28 = vpop.f32.mrb[13].mxu1 }
 0x166   : > { %401 = vst [vmem:[%s983_s17 + $0x68] sm:$0xff] %v331_v27  ;;  %417 = vst [vmem:[%s983_s17 + $0xe8] sm:$0xff] %v379_v28 }
 0x168   : > { %v335_v29 = vpop.f32.mrb[14].mxu0  ;;  %v383_v30 = vpop.f32.mrb[14].mxu1 }
 0x169   : > { %402 = vst [vmem:[%s983_s17 + $0x70] sm:$0xff] %v335_v29  ;;  %418 = vst [vmem:[%s983_s17 + $0xf0] sm:$0xff] %v383_v30  ;;  %v337_v31 = vpop.f32.mrb[15].mxu0  ;;  %v385_v32 = vpop.f32.mrb[15].mxu1 }
 0x16a   : > { %403 = vst [vmem:[%s983_s17 + $0x78] sm:$0xff] %v337_v31  ;;  %419 = vst [vmem:[%s983_s17 + $0xf8] sm:$0xff] %v385_v32 }
 0x16b   : > { %721 = shalt.err (!%p718_p7)
}
 0x16c   : > { %s722_s24 = scalar_lea.hbm %s1018_s4, 4096  ;;  %s726_s26 = scalar_lea.hbm %s1069_s2, 12288 }
 0x16d   : > { %p723_p9 = scmp.ne.s32.totalorder %s1018_s4, %s722_s24  ;;  %p727_p5 = scmp.lt.u32.totalorder %s1018_s4, %s1069_s2 }
 0x16e   : > { %p728_p10 = scmp.lt.u32.totalorder %s726_s26, %s722_s24  ;;  %p730_p1 = scmp.lt.u32.totalorder %s722_s24, %s1018_s4 }
 0x16f   : > { %p724_p11 = pnand %p723_p9, %p888_p12 }
 0x170   : > { %p729_p2 = por %p728_p10, %p727_p5 }
 0x171   : > { %p725_p0 = pneg %p724_p11 }
 0x172   : > { %p731_p4 = por %p730_p1, %p729_p2 }
 0x174   : > { %p732_p6 = pnand %p731_p4, %p725_p0 }
 0x176   : > { %735 = shalt.err (!%p732_p6)
}
 0x177   : > { %s788_s3 = smov 256   ;;  %s789_s15 = smov 16  }
 0x178   : > { %592 = dma.vmem_to_hbm [thread:$0]  (%p888_p12), %s1020_s22, 4096, %s1018_s4, %s421_s13, %s788_s3, %s788_s3, %s789_s15  }
 0x179 PF: > { %p609_p8 = scmp.ge.s32.totalorder %s778_s12, 2  ;;  %s450_s17 = sand.u32 1, %s766_s9  }
 0x17a   : > { %p1084_p13 = scmp.ne.s32.totalorder %s1074_s16, 0  ;;  %s451_s27 = scalar_lea.sflag [#allocation4], %s450_s17 }
 0x17c   : > { %p603_p3 = pnand %p609_p8, %p1084_p13 }
 0x17e   : > { %761 = dma.done.wait (!%p603_p3), %s451_s27, 4096  }
 0x17f   : > { %763 = vsyncadd (!%p603_p3), %s451_s27, 4294963200  ;;  %p16_p7 = scmp.ge.s32.totalorder %s858_s21, 5   ;;  %s1085_s9 = smov %s770_s10 }
 0x180   : > { %s1086_s10 = smov %s774_s11  ;;  %s1087_s11 = smov %s884_s8 }
 0x181   : > { %s1088_s12 = smov %s858_s21  ;;  %18 = sbr.rel (!%p16_p7) target bundleno = 6 (0x6), region = 77 }
 0x188   :  { %456 = vsyncpa [#allocation3], 1 }
 0x189   :  { %458 = vsyncpa [#allocation3 + $0x1], 1 }
 0x18a   :  { %459 = vsyncpa [#allocation6], 1 }
 0x18b   :  { %460 = vsyncpa [#allocation4], 1 }
 0x18c   :  { %462 = vsyncpa [#allocation4 + $0x1], 1 }

</bundles_post_ra>
